<compile_context>
chip_gen: v7x
topology: tpu7x:2x2x1
jax: 0.10.0
libtpu: 0.0.40
codegen_flags: <defaults>
</compile_context>

<pallas_src>
import functools

import jax
import jax.numpy as jnp
from jax.experimental import pallas as pl
from jax.experimental.pallas import tpu as pltpu


def _mha_kernel(x_ref, wqkv_ref, wo_ref, bo_ref, o_ref, *, num_heads, head_size):
    # x_ref:    (B, T, C)  bf16   whole batch (single grid step)
    # wqkv_ref: (3*nh, C, H) bf16 stacked per-(q|k|v, head) projection weights
    # wo_ref:   (nh, H, C) bf16   output projection split per head
    # bo_ref:   (1, C)     f32    output projection bias
    # o_ref:    (B, T, C)  f32    module output
    B, T, C = x_ref.shape
    nh, H = num_heads, head_size

    # Flatten batch into rows (contiguous leading-dim merge) and broadcast once
    # so the QKV projection is a single batched MXU contraction.
    x2d = x_ref[...].reshape(B * T, C)                       # bf16
    xg = jnp.broadcast_to(x2d, (3 * nh, B * T, C))           # hoisted, built once

    # One batched contraction for all (q|k|v, head) pairs: (3nh, BT, C)@(3nh, C, H)
    qkvh = jax.lax.dot_general(
        xg, wqkv_ref[...],
        dimension_numbers=(((2,), (1,)), ((0,), (0,))),
        preferred_element_type=jnp.float32)                  # (3nh, B*T, H) f32

    # Scale matches the PyTorch module exactly: C ** -0.5 (n_embd, not head_size).
    scale = jnp.float32(C) ** -0.5

    # Leading-dim slices (free) -> contiguous reshape (nh, B*T, H)->(nh*B, T, H)
    # in f32 (tile-aligned), then ONE bf16 cast per tensor.
    q = (qkvh[:nh] * scale).reshape(nh * B, T, H).astype(jnp.bfloat16)
    k = qkvh[nh:2 * nh].reshape(nh * B, T, H).astype(jnp.bfloat16)
    v = qkvh[2 * nh:].reshape(nh * B, T, H).astype(jnp.bfloat16)

    # Causal mask, built once and broadcast over the (head, batch) groups.
    row = jax.lax.broadcasted_iota(jnp.int32, (T, T), 0)
    col = jax.lax.broadcasted_iota(jnp.int32, (T, T), 1)
    causal = (col <= row)[None]                              # (1, T, T)
    neg = jnp.float32(-1e30)                                 # finite (safe vs inf-inf)

    # Scores for all (head, batch) groups in one batched contraction
    # ('gqd,gkd->gqk', contraction on the shared head dim — no transpose).
    s = jax.lax.dot_general(
        q, k, dimension_numbers=(((2,), (2,)), ((0,), (0,))),
        preferred_element_type=jnp.float32)                  # (nh*B, T, T)
    s = jnp.where(causal, s, neg)

    # Numerically-stable softmax along the last axis.
    m = jnp.max(s, axis=-1, keepdims=True)
    e = jnp.exp(s - m)
    p = e * pl.reciprocal(jnp.sum(e, axis=-1, keepdims=True), approx=True)
    # (dropout on attention weights: identity in eval mode)

    # PV product, one batched contraction ('gqk,gkd->gqd').
    o = jax.lax.dot_general(
        p.astype(jnp.bfloat16), v,
        dimension_numbers=(((2,), (1,)), ((0,), (0,))),
        preferred_element_type=jnp.float32)                  # (nh*B, T, H)

    # Output projection WITHOUT a lane concat:  concat_h(o_h) @ Wo
    #   == sum_h o_h @ Wo[h*H:(h+1)*H, :]  (per-head batched matmul + reduce).
    oh = o.reshape(nh, B * T, H).astype(jnp.bfloat16)        # contiguous merge
    partial = jax.lax.dot_general(
        oh, wo_ref[...],
        dimension_numbers=(((2,), (1,)), ((0,), (0,))),
        preferred_element_type=jnp.float32)                  # (nh, B*T, C)
    out2d = jnp.sum(partial, axis=0) + bo_ref[...]           # (B*T, C) f32
    # (output dropout: identity in eval mode)

    o_ref[...] = out2d.reshape(B, T, C).astype(o_ref.dtype)


def mha_forward(x, w_q, w_k, w_v, w_o, b_o, *, num_heads, head_size):
    """MultiHeadAttention forward (eval mode).

    x:   (B, T, C) float32
    w_q, w_k, w_v: (num_heads, C, head_size)  per-head projection weights,
                   stored transposed so the kernel does x @ W
    w_o: (D, C) output projection (transposed nn.Linear weight), D = num_heads*head_size
    b_o: (C,)   output projection bias
    Returns (B, T, C) float32.
    """
    B, T, C = x.shape
    H = head_size
    D = num_heads * H

    # Weight prep (once, in the wrapper): stack per-(q|k|v, head) weights on a
    # leading batch dim and cast to bf16 (halves weight DMA, removes in-kernel
    # casts).  Output projection split per head for the concat-free projection.
    w_qkv_h = jnp.concatenate([w_q, w_k, w_v], axis=0).astype(jnp.bfloat16)  # (3nh, C, H)
    wo_h = w_o.reshape(num_heads, H, C).astype(jnp.bfloat16)                 # (nh, H, C)
    b_o2 = b_o.reshape(1, C).astype(jnp.float32)
    x_bf = x.astype(jnp.bfloat16)

    kernel = functools.partial(_mha_kernel, num_heads=num_heads, head_size=head_size)

    flops = 2 * B * (T * C * 3 * D                      # QKV projection
                     + 2 * num_heads * T * T * H        # q@k^T and p@v
                     + T * D * C)                       # output projection
    bytes_accessed = int(2 * (x_bf.size + w_qkv_h.size + wo_h.size)   # bf16 in
                         + 4 * (C + B * T * C))                       # f32 bias + out

    # TODO(synk): output last dim C=64 < 128 lanes -> masked stores; becomes a
    # non-issue once n_embd >= 128 in production configs.
    return pl.pallas_call(
        kernel,
        out_shape=jax.ShapeDtypeStruct((B, T, C), x.dtype),
        grid_spec=pltpu.PrefetchScalarGridSpec(
            num_scalar_prefetch=0,
            grid=(1,),                                   # batch folded into one step
            in_specs=[
                pl.BlockSpec((B, T, C), lambda i: (0, 0, 0)),
                pl.BlockSpec((3 * num_heads, C, H), lambda i: (0, 0, 0)),
                pl.BlockSpec((num_heads, H, C), lambda i: (0, 0, 0)),
                pl.BlockSpec((1, C), lambda i: (0, 0)),
            ],
            out_specs=pl.BlockSpec((B, T, C), lambda i: (0, 0, 0)),
        ),
        compiler_params=pltpu.CompilerParams(
            dimension_semantics=("arbitrary",),
        ),
        cost_estimate=pl.CostEstimate(
            flops=flops,
            transcendentals=B * num_heads * T * T,
            bytes_accessed=bytes_accessed),
    )(x_bf, w_qkv_h, wo_h, b_o2)


def _reference(x, w_q, w_k, w_v, w_o, b_o, *, num_heads, head_size,
               matmul_dtype=jnp.float32):
    """Pure-JAX reference mirroring the PyTorch forward (eval mode).

    matmul_dtype lets the reference mirror the kernel's bf16-matmul /
    f32-accumulate precision policy so the comparison isolates kernel logic.
    """
    B, T, C = x.shape

    def mm(a, b):
        return jnp.matmul(a.astype(matmul_dtype), b.astype(matmul_dtype),
                          preferred_element_type=jnp.float32)

    mask = jnp.tril(jnp.ones((T, T), dtype=bool))
    outs = []
    for h in range(num_heads):
        k = mm(x, w_k[h])
        q = mm(x, w_q[h])
        v = mm(x, w_v[h])
        w = mm(q * C ** -0.5, jnp.swapaxes(k, -2, -1))
        w = jnp.where(mask, w, -jnp.inf)
        w = jax.nn.softmax(w, axis=-1)
        outs.append(mm(w, v))
    out = jnp.concatenate(outs, axis=-1)
    return mm(out, w_o) + b_o.reshape(1, 1, C)


if __name__ == "__main__":
    # Small shapes consistent with the module: num_heads=4, head_size=16
    # (so n_embd = 64), block_size = T = 8, batch = 2.
    B, T = 2, 8
    num_heads, head_size = 4, 16
    C = num_heads * head_size     # n_embd
    D = num_heads * head_size

    key = jax.random.PRNGKey(0)
    kx, kq, kk, kv, ko, kb = jax.random.split(key, 6)
    x = jax.random.normal(kx, (B, T, C), dtype=jnp.float32)
    # Deterministic param init (like nn.Linear): scaled normals.
    w_q = jax.random.normal(kq, (num_heads, C, head_size), jnp.float32) * C ** -0.5
    w_k = jax.random.normal(kk, (num_heads, C, head_size), jnp.float32) * C ** -0.5
    w_v = jax.random.normal(kv, (num_heads, C, head_size), jnp.float32) * C ** -0.5
    w_o = jax.random.normal(ko, (D, C), jnp.float32) * D ** -0.5
    b_o = jax.random.normal(kb, (C,), jnp.float32) * 0.1

    out = mha_forward(x, w_q, w_k, w_v, w_o, b_o,
                      num_heads=num_heads, head_size=head_size)
    out = jax.block_until_ready(out)

    # Compare against a reference using the same bf16-matmul / f32-accumulate
    # precision policy as the kernel.
    ref = _reference(x, w_q, w_k, w_v, w_o, b_o,
                     num_heads=num_heads, head_size=head_size,
                     matmul_dtype=jnp.bfloat16)
    assert out.shape == (B, T, C)
    max_diff = float(jnp.max(jnp.abs(out - ref)))
    assert jnp.allclose(out, ref, atol=1e-2, rtol=1e-2), (
        f"mismatch vs reference: max abs diff {max_diff}")

    print("KERNEL_OK")
</pallas_src>

<mosaic_0001>
module attributes {stable_mosaic.version = 11 : i64} {
  func.func @_mha_kernel(%arg0: i32, %arg1: memref<2x8x64xbf16, #tpu.memory_space<vmem>>, %arg2: memref<12x64x16xbf16, #tpu.memory_space<vmem>>, %arg3: memref<4x16x64xbf16, #tpu.memory_space<vmem>>, %arg4: memref<1x64xf32, #tpu.memory_space<vmem>>, %arg5: memref<2x8x64xf32, #tpu.memory_space<vmem>>) attributes {dimension_semantics = [#tpu.dimension_semantics<arbitrary>], iteration_bounds = array<i64: 1>, scalar_prefetch = 0 : i64, scratch_operands = 0 : i64, tpu.core_type = #tpu.core_type<tc>, window_params = [{pipeline_mode = #tpu.pipeline_mode<synchronous>, transform_indices = @transform_0, window_bounds = array<i64: 2, 8, 64>}, {pipeline_mode = #tpu.pipeline_mode<synchronous>, transform_indices = @transform_1, window_bounds = array<i64: 12, 64, 16>}, {pipeline_mode = #tpu.pipeline_mode<synchronous>, transform_indices = @transform_2, window_bounds = array<i64: 4, 16, 64>}, {pipeline_mode = #tpu.pipeline_mode<synchronous>, transform_indices = @transform_3, window_bounds = array<i64: 1, 64>}, {pipeline_mode = #tpu.pipeline_mode<synchronous>, transform_indices = @transform_4, window_bounds = array<i64: 2, 8, 64>}]} {
    %c0 = arith.constant 0 : index
    %c0_0 = arith.constant 0 : index
    %c0_1 = arith.constant 0 : index
    %0 = vector.load %arg1[%c0, %c0_0, %c0_1] : memref<2x8x64xbf16, #tpu.memory_space<vmem>>, vector<2x8x64xbf16>
    %1 = vector.shape_cast %0 : vector<2x8x64xbf16> to vector<16x64xbf16>
    %2 = vector.shape_cast %1 : vector<16x64xbf16> to vector<1x16x64xbf16>
    %3 = vector.broadcast %2 : vector<1x16x64xbf16> to vector<12x16x64xbf16>
    %c0_2 = arith.constant 0 : index
    %c0_3 = arith.constant 0 : index
    %c0_4 = arith.constant 0 : index
    %4 = vector.load %arg2[%c0_2, %c0_3, %c0_4] : memref<12x64x16xbf16, #tpu.memory_space<vmem>>, vector<12x64x16xbf16>
    %cst = arith.constant dense<0.000000e+00> : vector<12x16x16xf32>
    %5 = tpu.matmul %3, %4, %cst {dimension_numbers = #tpu.dot_dimension_numbers<[2], [1], [1], [2], [0, 0, 0, 1, 1, 2], [0], [0]>} : vector<12x16x64xbf16>, vector<12x64x16xbf16>, vector<12x16x16xf32> -> vector<12x16x16xf32>
    %cst_5 = arith.constant 6.400000e+01 : f32
    %cst_6 = arith.constant -5.000000e-01 : f32
    %6 = math.powf %cst_5, %cst_6 : f32
    %7 = vector.extract_strided_slice %5 {offsets = [0, 0, 0], sizes = [4, 16, 16], strides = [1, 1, 1]} : vector<12x16x16xf32> to vector<4x16x16xf32>
    %8 = vector.broadcast %6 : f32 to vector<4x16x16xf32>
    %9 = arith.mulf %7, %8 : vector<4x16x16xf32>
    %10 = vector.shape_cast %9 : vector<4x16x16xf32> to vector<8x8x16xf32>
    %11 = arith.truncf %10 : vector<8x8x16xf32> to vector<8x8x16xbf16>
    %12 = vector.extract_strided_slice %5 {offsets = [4, 0, 0], sizes = [4, 16, 16], strides = [1, 1, 1]} : vector<12x16x16xf32> to vector<4x16x16xf32>
    %13 = vector.shape_cast %12 : vector<4x16x16xf32> to vector<8x8x16xf32>
    %14 = arith.truncf %13 : vector<8x8x16xf32> to vector<8x8x16xbf16>
    %15 = vector.extract_strided_slice %5 {offsets = [8, 0, 0], sizes = [4, 16, 16], strides = [1, 1, 1]} : vector<12x16x16xf32> to vector<4x16x16xf32>
    %16 = vector.shape_cast %15 : vector<4x16x16xf32> to vector<8x8x16xf32>
    %17 = arith.truncf %16 : vector<8x8x16xf32> to vector<8x8x16xbf16>
    %18 = tpu.iota {dimensions = array<i32: 0>} : vector<8x8xi32>
    %19 = tpu.iota {dimensions = array<i32: 1>} : vector<8x8xi32>
    %20 = arith.cmpi sle, %19, %18 : vector<8x8xi32>
    %21 = vector.shape_cast %20 : vector<8x8xi1> to vector<1x8x8xi1>
    %cst_7 = arith.constant dense<0.000000e+00> : vector<8x8x8xf32>
    %22 = tpu.matmul %11, %14, %cst_7 {dimension_numbers = #tpu.dot_dimension_numbers<[2], [2], [1], [1], [0, 0, 0, 1, 1, 1], [0], [0]>} : vector<8x8x16xbf16>, vector<8x8x16xbf16>, vector<8x8x8xf32> -> vector<8x8x8xf32>
    %cst_8 = arith.constant -1.000000e+30 : f32
    %23 = vector.shape_cast %21 : vector<1x8x8xi1> to vector<1x8x8xi1>
    %24 = vector.broadcast %23 : vector<1x8x8xi1> to vector<8x8x8xi1>
    %25 = vector.broadcast %cst_8 : f32 to vector<8x8x8xf32>
    %26 = arith.select %24, %22, %25 : vector<8x8x8xi1>, vector<8x8x8xf32>
    %cst_9 = arith.constant dense<0xFF800000> : vector<8x8xf32>
    %27 = vector.multi_reduction <maximumf>, %26, %cst_9 [2] : vector<8x8x8xf32> to vector<8x8xf32>
    %28 = vector.shape_cast %27 : vector<8x8xf32> to vector<8x8x1xf32>
    %29 = vector.broadcast %28 : vector<8x8x1xf32> to vector<8x8x8xf32>
    %30 = arith.subf %26, %29 : vector<8x8x8xf32>
    %31 = math.exp %30 : vector<8x8x8xf32>
    %cst_10 = arith.constant dense<0.000000e+00> : vector<8x8xf32>
    %32 = vector.multi_reduction <add>, %31, %cst_10 [2] : vector<8x8x8xf32> to vector<8x8xf32>
    %33 = vector.shape_cast %32 : vector<8x8xf32> to vector<8x8x1xf32>
    %34 = tpu.reciprocal %33 {approx = true} : vector<8x8x1xf32> -> vector<8x8x1xf32>
    %35 = vector.broadcast %34 : vector<8x8x1xf32> to vector<8x8x8xf32>
    %36 = arith.mulf %31, %35 : vector<8x8x8xf32>
    %37 = arith.truncf %36 : vector<8x8x8xf32> to vector<8x8x8xbf16>
    %cst_11 = arith.constant dense<0.000000e+00> : vector<8x8x16xf32>
    %38 = tpu.matmul %37, %17, %cst_11 {dimension_numbers = #tpu.dot_dimension_numbers<[2], [1], [1], [2], [0, 0, 0, 1, 1, 2], [0], [0]>} : vector<8x8x8xbf16>, vector<8x8x16xbf16>, vector<8x8x16xf32> -> vector<8x8x16xf32>
    %39 = vector.shape_cast %38 : vector<8x8x16xf32> to vector<4x16x16xf32>
    %40 = arith.truncf %39 : vector<4x16x16xf32> to vector<4x16x16xbf16>
    %c0_12 = arith.constant 0 : index
    %c0_13 = arith.constant 0 : index
    %c0_14 = arith.constant 0 : index
    %41 = vector.load %arg3[%c0_12, %c0_13, %c0_14] : memref<4x16x64xbf16, #tpu.memory_space<vmem>>, vector<4x16x64xbf16>
    %cst_15 = arith.constant dense<0.000000e+00> : vector<4x16x64xf32>
    %42 = tpu.matmul %40, %41, %cst_15 {dimension_numbers = #tpu.dot_dimension_numbers<[2], [1], [1], [2], [0, 0, 0, 1, 1, 2], [0], [0]>} : vector<4x16x16xbf16>, vector<4x16x64xbf16>, vector<4x16x64xf32> -> vector<4x16x64xf32>
    %cst_16 = arith.constant dense<0.000000e+00> : vector<16x64xf32>
    %43 = vector.multi_reduction <add>, %42, %cst_16 [0] : vector<4x16x64xf32> to vector<16x64xf32>
    %c0_17 = arith.constant 0 : index
    %c0_18 = arith.constant 0 : index
    %44 = vector.load %arg4[%c0_17, %c0_18] : memref<1x64xf32, #tpu.memory_space<vmem>>, vector<1x64xf32>
    %45 = vector.broadcast %44 : vector<1x64xf32> to vector<16x64xf32>
    %46 = arith.addf %43, %45 : vector<16x64xf32>
    %47 = vector.shape_cast %46 : vector<16x64xf32> to vector<2x8x64xf32>
    %c0_19 = arith.constant 0 : index
    %c0_20 = arith.constant 0 : index
    %c0_21 = arith.constant 0 : index
    %48 = vector.load %arg5[%c0_19, %c0_20, %c0_21] : memref<2x8x64xf32, #tpu.memory_space<vmem>>, vector<2x8x64xf32>
    tpu.vector_store %arg5[%c0_19, %c0_20, %c0_21], %47 {strides = array<i32>} : memref<2x8x64xf32, #tpu.memory_space<vmem>>, vector<2x8x64xf32>,
    return
  }
  func.func @transform_0(%arg0: i32) -> (i32, i32, i32) {
    %c0_i32 = arith.constant 0 : i32
    %c0_i32_0 = arith.constant 0 : i32
    %c0_i32_1 = arith.constant 0 : i32
    %c0_i32_2 = arith.constant 0 : i32
    return %c0_i32, %c0_i32_0, %c0_i32_1 : i32, i32, i32
  }
  func.func @transform_1(%arg0: i32) -> (i32, i32, i32) {
    %c0_i32 = arith.constant 0 : i32
    %c0_i32_0 = arith.constant 0 : i32
    %c0_i32_1 = arith.constant 0 : i32
    %c0_i32_2 = arith.constant 0 : i32
    return %c0_i32, %c0_i32_0, %c0_i32_1 : i32, i32, i32
  }
  func.func @transform_2(%arg0: i32) -> (i32, i32, i32) {
    %c0_i32 = arith.constant 0 : i32
    %c0_i32_0 = arith.constant 0 : i32
    %c0_i32_1 = arith.constant 0 : i32
    %c0_i32_2 = arith.constant 0 : i32
    return %c0_i32, %c0_i32_0, %c0_i32_1 : i32, i32, i32
  }
  func.func @transform_3(%arg0: i32) -> (i32, i32) {
    %c0_i32 = arith.constant 0 : i32
    %c0_i32_0 = arith.constant 0 : i32
    %c0_i32_1 = arith.constant 0 : i32
    return %c0_i32, %c0_i32_0 : i32, i32
  }
  func.func @transform_4(%arg0: i32) -> (i32, i32, i32) {
    %c0_i32 = arith.constant 0 : i32
    %c0_i32_0 = arith.constant 0 : i32
    %c0_i32_1 = arith.constant 0 : i32
    %c0_i32_2 = arith.constant 0 : i32
    return %c0_i32, %c0_i32_0, %c0_i32_1 : i32, i32, i32
  }
}

</mosaic_0001>

<bundles_post_ra>
// kernel: tpu_custom_call.1
= control target key start
LH: loop header
LB: loop body
LE: loop exit
PB: predicated region body
PF: predicated region fallthrough
CT: control target
= control target key end

     0   :  { %v2605_v1 = vmov 0.0   ;;  %vm2606_vm0 = vmmov 0   ;;  %vm146_vm1 = vcmask 523264   ;;  %s3080_s0 = inlined_call_operand.vmem [shape: bf16[2,8,64], index: 0, kind: input, shape index: {}]   ;;  %s3081_s1 = inlined_call_operand.vmem [shape: bf16[12,64,16], index: 1, kind: input, shape index: {}]   ;;  %s3082_s2 = inlined_call_operand.vmem [shape: bf16[4,16,64], index: 2, kind: input, shape index: {}]   ;;  %s3083_s3 = inlined_call_operand.vmem [shape: f32[1,64], index: 3, kind: input, shape index: {}]   ;;  %s3084_s4 = inlined_call_operand.hbm [shape: f32[2,8,64], index: 4, kind: output, shape index: {}]  }
   0x1   :  { %v2496_v0 = vld [vmem:[%s3081_s1] sm:$0xff]   ;;  %2227 = vmatprep.subr.bf16.mxu0 %v2605_v1  ;;  %v2497_v2 = vld [vmem:[%s3081_s1 + $0x8] sm:$0xff]   ;;  %2239 = vmatprep.subr.bf16.mxu1 %v2605_v1  ;;  %v2499_v5 = vld [vmem:[%s3081_s1 + $0x10] sm:$0xff]  }
   0x2   :  { %2228 = vmatpush3.bf16.msra.mxu0 %v2496_v0  ;;  %v2498_v3 = vld [vmem:[%s3081_s1 + $0x20] sm:$0xff]   ;;  %2235 = vmatprep.mubr.msk.bf16.mxu0 %vm2606_vm0, %v2605_v1  ;;  %v2500_v4 = vld [vmem:[%s3081_s1 + $0x28] sm:$0xff]   ;;  %v2502_v6 = vld [vmem:[%s3081_s1 + $0x30] sm:$0xff]  }
   0x3   :  { %2229 = vmatprep.subr.bf16.mxu0 %v2605_v1  ;;  %2247 = vmatprep.mubr.msk.bf16.mxu1 %vm2606_vm0, %v2605_v1  ;;  %v2501_v7 = vld [vmem:[%s3081_s1 + $0x18] sm:$0xff]   ;;  %v2673_v9 = vld [vmem:[%s3080_s0] sm:$0xff]   ;;  %v2506_v12 = vld [vmem:[%s3081_s1 + $0x48] sm:$0xff]  }
   0x4   :  { %2240 = vmatpush3.bf16.msra.mxu1 %v2498_v3  ;;  %v2505_v8 = vld [vmem:[%s3081_s1 + $0x38] sm:$0xff]   ;;  %v2504_v10 = vld [vmem:[%s3081_s1 + $0x40] sm:$0xff]   ;;  %v2509_v13 = vld [vmem:[%s3081_s1 + $0x68] sm:$0xff]  }
   0x5   :  { %2241 = vmatprep.subr.bf16.mxu1 %v2605_v1  ;;  %v2507_v11 = vld [vmem:[%s3081_s1 + $0x60] sm:$0xff]   ;;  %v2508_v14 = vld [vmem:[%s3081_s1 + $0x50] sm:$0xff]   ;;  %v2510_v16 = vld [vmem:[%s3081_s1 + $0x58] sm:$0xff]  }
   0x6   :  { %2230 = vmatpush3.bf16.msra.mxu0 %v2497_v2  ;;  %v2511_v15 = vld [vmem:[%s3081_s1 + $0x70] sm:$0xff]   ;;  %v2513_v17 = vld [vmem:[%s3081_s1 + $0x78] sm:$0xff]   ;;  %v2512_v18 = vld [vmem:[%s3081_s1 + $0x80] sm:$0xff]  }
   0x7   :  { %2231 = vmatprep.subr.bf16.mxu0 %v2605_v1  ;;  %v2515_v19 = vld [vmem:[%s3081_s1 + $0xa0] sm:$0xff]   ;;  %v2514_v20 = vld [vmem:[%s3081_s1 + $0x88] sm:$0xff]   ;;  %v2516_v22 = vld [vmem:[%s3081_s1 + $0x90] sm:$0xff]  }
   0x8   :  { %2242 = vmatpush3.bf16.msra.mxu1 %v2500_v4  ;;  %v2517_v21 = vld [vmem:[%s3081_s1 + $0xa8] sm:$0xff]   ;;  %v2519_v23 = vld [vmem:[%s3081_s1 + $0xb0] sm:$0xff]   ;;  %v2518_v24 = vld [vmem:[%s3081_s1 + $0x98] sm:$0xff]  }
   0x9   :  { %2243 = vmatprep.subr.bf16.mxu1 %v2605_v1  ;;  %v2521_v25 = vld [vmem:[%s3081_s1 + $0xb8] sm:$0xff]   ;;  %v2520_v26 = vld [vmem:[%s3081_s1 + $0xc0] sm:$0xff]  }
   0xa   :  { %2232 = vmatpush3.bf16.msra.mxu0 %v2499_v5 }
   0xb   :  { %2233 = vmatprep.subr.bf16.mxu0 %v2605_v1 }
   0xc   :  { %2244 = vmatpush3.bf16.msra.mxu1 %v2502_v6 }
   0xd   :  { %2245 = vmatprep.subr.bf16.mxu1 %v2605_v1 }
   0xe   :  { %2234 = vmatpush3.bf16.msra.mxu0 %v2501_v7 }
   0xf   :  { %2251 = vmatprep.subr.bf16.mxu0 %v2605_v1 }
  0x10   :  { %2246 = vmatpush3.bf16.msra.mxu1 %v2505_v8 }
  0x11   :  { %2236 = vmatmul.mubr.msk.bf16.vlgmr.msra.gmra.mrb[0].mxu0 %vm146_vm1, %v2673_v9  ;;  %2263 = vmatprep.subr.bf16.mxu1 %v2605_v1 }
  0x12   :  { %2252 = vmatpush3.bf16.msra.mxu0 %v2504_v10  ;;  %2259 = vmatprep.mubr.msk.bf16.mxu0 %vm2606_vm0, %v2605_v1 }
  0x13   :  { %2253 = vmatprep.subr.bf16.mxu0 %v2605_v1  ;;  %2248 = vmatmul.mubr.msk.bf16.vlgmr.msra.gmra.mrb[0].mxu1 %vm146_vm1, %v2673_v9 }
  0x14   :  { %2264 = vmatpush3.bf16.msra.mxu1 %v2507_v11  ;;  %2271 = vmatprep.mubr.msk.bf16.mxu1 %vm2606_vm0, %v2605_v1 }
  0x15   :  { %2265 = vmatprep.subr.bf16.mxu1 %v2605_v1 }
  0x16   :  { %2254 = vmatpush3.bf16.msra.mxu0 %v2506_v12 }
  0x17   :  { %2255 = vmatprep.subr.bf16.mxu0 %v2605_v1 }
  0x18   :  { %2266 = vmatpush3.bf16.msra.mxu1 %v2509_v13 }
  0x19   :  { %2267 = vmatprep.subr.bf16.mxu1 %v2605_v1 }
  0x1a   :  { %2256 = vmatpush3.bf16.msra.mxu0 %v2508_v14 }
  0x1b   :  { %2257 = vmatprep.subr.bf16.mxu0 %v2605_v1 }
  0x1c   :  { %2268 = vmatpush3.bf16.msra.mxu1 %v2511_v15 }
  0x1d   :  { %2269 = vmatprep.subr.bf16.mxu1 %v2605_v1 }
  0x1e   :  { %2258 = vmatpush3.bf16.msra.mxu0 %v2510_v16 }
  0x1f   :  { %2275 = vmatprep.subr.bf16.mxu0 %v2605_v1 }
  0x20   :  { %2270 = vmatpush3.bf16.msra.mxu1 %v2513_v17 }
  0x21   :  { %2260 = vmatmul.mubr.msk.bf16.vlgmr.msra.gmra.mrb[4].mxu0 %vm146_vm1, %v2673_v9  ;;  %2287 = vmatprep.subr.bf16.mxu1 %v2605_v1 }
  0x22   :  { %2276 = vmatpush3.bf16.msra.mxu0 %v2512_v18  ;;  %2283 = vmatprep.mubr.msk.bf16.mxu0 %vm2606_vm0, %v2605_v1 }
  0x23   :  { %2277 = vmatprep.subr.bf16.mxu0 %v2605_v1  ;;  %2272 = vmatmul.mubr.msk.bf16.vlgmr.msra.gmra.mrb[4].mxu1 %vm146_vm1, %v2673_v9 }
  0x24   :  { %2288 = vmatpush3.bf16.msra.mxu1 %v2515_v19  ;;  %2295 = vmatprep.mubr.msk.bf16.mxu1 %vm2606_vm0, %v2605_v1 }
  0x25   :  { %2289 = vmatprep.subr.bf16.mxu1 %v2605_v1 }
  0x26   :  { %2278 = vmatpush3.bf16.msra.mxu0 %v2514_v20 }
  0x27   :  { %2279 = vmatprep.subr.bf16.mxu0 %v2605_v1 }
  0x28   :  { %2290 = vmatpush3.bf16.msra.mxu1 %v2517_v21 }
  0x29   :  { %2291 = vmatprep.subr.bf16.mxu1 %v2605_v1 }
  0x2a   :  { %2280 = vmatpush3.bf16.msra.mxu0 %v2516_v22 }
  0x2b   :  { %2281 = vmatprep.subr.bf16.mxu0 %v2605_v1 }
  0x2c   :  { %2292 = vmatpush3.bf16.msra.mxu1 %v2519_v23 }
  0x2d   :  { %2293 = vmatprep.subr.bf16.mxu1 %v2605_v1 }
  0x2e   :  { %2282 = vmatpush3.bf16.msra.mxu0 %v2518_v24 }
  0x2f   :  { %9 = vsyncpa [#allocation3], 0  ;;  %2299 = vmatprep.subr.bf16.mxu0 %v2605_v1  ;;  %v2523_v27 = vld [vmem:[%s3081_s1 + $0xe0] sm:$0xff]   ;;  %v2522_v28 = vld [vmem:[%s3081_s1 + $0xc8] sm:$0xff]   ;;  %vm943_vm2 = vcmask 130048   ;;  %vm1422_vm3 = vcmask 1043456  }
  0x30   :  { %2294 = vmatpush3.bf16.msra.mxu1 %v2521_v25  ;;  %v2525_v29 = vld [vmem:[%s3081_s1 + $0xe8] sm:$0xff]   ;;  %v2524_v30 = vld [vmem:[%s3081_s1 + $0xd0] sm:$0xff]   ;;  %v2526_v32 = vld [vmem:[%s3081_s1 + $0xd8] sm:$0xff]   ;;  %vm1322_vm5 = vcmask 64512   ;;  %s2607_s13 = smov [#allocation2]  }
  0x31   :  { %2284 = vmatmul.mubr.msk.bf16.vlgmr.msra.gmra.mrb[8].mxu0 %vm146_vm1, %v2673_v9  ;;  %2311 = vmatprep.subr.bf16.mxu1 %v2605_v1  ;;  %v2527_v31 = vld [vmem:[%s3081_s1 + $0xf0] sm:$0xff]   ;;  %v2528_v33 = vld [vmem:[%s3081_s1 + $0xf8] sm:$0xff]   ;;  %v2529_v34 = vld [vmem:[%s3081_s1 + $0x100] sm:$0xff]   ;;  %s2030_s14 = sshll.u32 %s2607_s13, 4  ;;  %s2031_s14 = int_to_ptr.vmem [resolvable:$true] %s2030_s14 }
  0x32   :  { %2300 = vmatpush3.bf16.msra.mxu0 %v2520_v26  ;;  %2307 = vmatprep.mubr.msk.bf16.mxu0 %vm2606_vm0, %v2605_v1  ;;  %v2530_v35 = vld [vmem:[%s3081_s1 + $0x108] sm:$0xff]   ;;  %v2531_v36 = vld [vmem:[%s3081_s1 + $0x120] sm:$0xff]   ;;  %v2532_v37 = vld [vmem:[%s3081_s1 + $0x110] sm:$0xff]   ;;  %s2581_s15 = scalar_lea.vmem %s2031_s14, 256  ;;  %p2586_p1 = scmp.lt.s32.totalorder %s2031_s14, %s2031_s14 }
  0x33   :  { %2301 = vmatprep.subr.bf16.mxu0 %v2605_v1  ;;  %2296 = vmatmul.mubr.msk.bf16.vlgmr.msra.gmra.mrb[8].mxu1 %vm146_vm1, %v2673_v9  ;;  %v2533_v38 = vld [vmem:[%s3081_s1 + $0x128] sm:$0xff]   ;;  %v2534_v39 = vld [vmem:[%s3081_s1 + $0x118] sm:$0xff]   ;;  %v2535_v40 = vld [vmem:[%s3081_s1 + $0x130] sm:$0xff]   ;;  %p2582_p0 = scmp.ne.s32.totalorder %s2031_s14, %s2581_s15  ;;  %p2587_p2 = scmp.lt.s32.totalorder %s2581_s15, %s2581_s15 }
  0x34   :  { %2312 = vmatpush3.bf16.msra.mxu1 %v2523_v27  ;;  %2319 = vmatprep.mubr.msk.bf16.mxu1 %vm2606_vm0, %v2605_v1  ;;  %v2536_v41 = vld [vmem:[%s3081_s1 + $0x138] sm:$0xff]   ;;  %v2537_v42 = vld [vmem:[%s3081_s1 + $0x140] sm:$0xff]   ;;  %v2539_v44 = vld [vmem:[%s3081_s1 + $0x148] sm:$0xff]  }
  0x35   :  { %2313 = vmatprep.subr.bf16.mxu1 %v2605_v1  ;;  %v2538_v43 = vld [vmem:[%s3081_s1 + $0x160] sm:$0xff]   ;;  %v2540_v45 = vld [vmem:[%s3081_s1 + $0x168] sm:$0xff]   ;;  %v2541_v46 = vld [vmem:[%s3081_s1 + $0x150] sm:$0xff]   ;;  %p2588_p3 = por %p2587_p2, %p2586_p1 }
  0x36   :  { %2302 = vmatpush3.bf16.msra.mxu0 %v2522_v28  ;;  %v2542_v47 = vld [vmem:[%s3081_s1 + $0x170] sm:$0xff]   ;;  %v2543_v48 = vld [vmem:[%s3081_s1 + $0x158] sm:$0xff]  }
  0x37   :  { %2303 = vmatprep.subr.bf16.mxu0 %v2605_v1  ;;  %v2544_v49 = vld [vmem:[%s3081_s1 + $0x178] sm:$0xff]   ;;  %p2589_p4 = pnand %p2588_p3, %p2582_p0 }
  0x38   :  { %2314 = vmatpush3.bf16.msra.mxu1 %v2525_v29 }
  0x39   :  { %2315 = vmatprep.subr.bf16.mxu1 %v2605_v1 }
  0x3a   :  { %2304 = vmatpush3.bf16.msra.mxu0 %v2524_v30 }
  0x3b   :  { %2305 = vmatprep.subr.bf16.mxu0 %v2605_v1 }
  0x3c   :  { %2316 = vmatpush3.bf16.msra.mxu1 %v2527_v31 }
  0x3d   :  { %2317 = vmatprep.subr.bf16.mxu1 %v2605_v1 }
  0x3e   :  { %2306 = vmatpush3.bf16.msra.mxu0 %v2526_v32 }
  0x3f   :  { %2323 = vmatprep.subr.bf16.mxu0 %v2605_v1 }
  0x40   :  { %2318 = vmatpush3.bf16.msra.mxu1 %v2528_v33 }
  0x41   :  { %2308 = vmatmul.mubr.msk.bf16.vlgmr.msra.gmra.mrb[12].mxu0 %vm146_vm1, %v2673_v9  ;;  %2335 = vmatprep.subr.bf16.mxu1 %v2605_v1 }
  0x42   :  { %2324 = vmatpush3.bf16.msra.mxu0 %v2529_v34  ;;  %2331 = vmatprep.mubr.msk.bf16.mxu0 %vm2606_vm0, %v2605_v1 }
  0x43   :  { %2320 = vmatmul.mubr.msk.bf16.vlgmr.msra.gmra.mrb[12].mxu1 %vm146_vm1, %v2673_v9  ;;  %2325 = vmatprep.subr.bf16.mxu0 %v2605_v1 }
  0x44   :  { %2343 = vmatprep.mubr.msk.bf16.mxu1 %vm2606_vm0, %v2605_v1  ;;  %2336 = vmatpush3.bf16.msra.mxu1 %v2531_v36 }
  0x45   :  { %2337 = vmatprep.subr.bf16.mxu1 %v2605_v1 }
  0x46   :  { %2326 = vmatpush3.bf16.msra.mxu0 %v2530_v35 }
  0x47   :  { %2327 = vmatprep.subr.bf16.mxu0 %v2605_v1 }
  0x48   :  { %2338 = vmatpush3.bf16.msra.mxu1 %v2533_v38 }
  0x49   :  { %2339 = vmatprep.subr.bf16.mxu1 %v2605_v1 }
  0x4a   :  { %2328 = vmatpush3.bf16.msra.mxu0 %v2532_v37 }
  0x4b   :  { %2329 = vmatprep.subr.bf16.mxu0 %v2605_v1 }
  0x4c   :  { %2340 = vmatpush3.bf16.msra.mxu1 %v2535_v40 }
  0x4d   :  { %2341 = vmatprep.subr.bf16.mxu1 %v2605_v1 }
  0x4e   :  { %2330 = vmatpush3.bf16.msra.mxu0 %v2534_v39 }
  0x4f   :  { %2347 = vmatprep.subr.bf16.mxu0 %v2605_v1 }
  0x50   :  { %2342 = vmatpush3.bf16.msra.mxu1 %v2536_v41 }
  0x51   :  { %2332 = vmatmul.mubr.msk.bf16.vlgmr.msra.gmra.mrb[16].mxu0 %vm146_vm1, %v2673_v9  ;;  %2359 = vmatprep.subr.bf16.mxu1 %v2605_v1 }
  0x52   :  { %2348 = vmatpush3.bf16.msra.mxu0 %v2537_v42  ;;  %2355 = vmatprep.mubr.msk.bf16.mxu0 %vm2606_vm0, %v2605_v1 }
  0x53   :  { %2349 = vmatprep.subr.bf16.mxu0 %v2605_v1  ;;  %2344 = vmatmul.mubr.msk.bf16.vlgmr.msra.gmra.mrb[16].mxu1 %vm146_vm1, %v2673_v9 }
  0x54   :  { %2360 = vmatpush3.bf16.msra.mxu1 %v2538_v43  ;;  %2367 = vmatprep.mubr.msk.bf16.mxu1 %vm2606_vm0, %v2605_v1 }
  0x55   :  { %2361 = vmatprep.subr.bf16.mxu1 %v2605_v1 }
  0x56   :  { %2350 = vmatpush3.bf16.msra.mxu0 %v2539_v44 }
  0x57   :  { %2351 = vmatprep.subr.bf16.mxu0 %v2605_v1 }
  0x58   :  { %2362 = vmatpush3.bf16.msra.mxu1 %v2540_v45 }
  0x59   :  { %2363 = vmatprep.subr.bf16.mxu1 %v2605_v1 }
  0x5a   :  { %2352 = vmatpush3.bf16.msra.mxu0 %v2541_v46 }
  0x5b   :  { %2353 = vmatprep.subr.bf16.mxu0 %v2605_v1 }
  0x5c   :  { %2364 = vmatpush3.bf16.msra.mxu1 %v2542_v47 }
  0x5d   :  { %2365 = vmatprep.subr.bf16.mxu1 %v2605_v1 }
  0x5e   :  { %2354 = vmatpush3.bf16.msra.mxu0 %v2543_v48 }
  0x5f   :  { %2371 = vmatprep.subr.bf16.mxu0 %v2605_v1 }
  0x60   :  { %2366 = vmatpush3.bf16.msra.mxu1 %v2544_v49 }
  0x61   :  { %2356 = vmatmul.mubr.msk.bf16.vlgmr.msra.gmra.mrb[20].mxu0 %vm146_vm1, %v2673_v9  ;;  %2377 = vmatprep.subr.bf16.mxu1 %v2605_v1 }
  0x62   :  { %2373 = vmatprep.mubr.msk.bf16.mxu0 %vm2606_vm0, %v2605_v1 }
  0x63   :  { %2368 = vmatmul.mubr.msk.bf16.vlgmr.msra.gmra.mrb[20].mxu1 %vm146_vm1, %v2673_v9 }
  0x64   :  { %2379 = vmatprep.mubr.msk.bf16.mxu1 %vm2606_vm0, %v2605_v1 }
  0xe4   :  { %v184_v50 = vpop.f32.mrb[0].mxu0 }
  0xe5   :  { %v2237_v51 = vpop.f32.mrb[1].mxu0  ;;  %v906_v13 = vmul.f32 0.125, %v184_v50 }
  0xe6   :  { %v187_v52 = vpop.f32.mrb[2].mxu0  ;;  %v249_v53 = vpop.f32.mrb[0].mxu1 }
  0xe7   :  { %v2238_v54 = vpop.f32.mrb[3].mxu0  ;;  %v2249_v55 = vpop.f32.mrb[1].mxu1  ;;  %v907_v17 = vmul.f32 0.125, %v187_v52  ;;  %v914_v18 = vpack.c.bf16 %v906_v13, %v906_v13  ;;  %v908_v22 = vmul.f32 0.125, %v249_v53 }
  0xe8   :  { %v252_v56 = vpop.f32.mrb[2].mxu1 }
  0xe9   :  { %v2250_v57 = vpop.f32.mrb[3].mxu1  ;;  %v915_v21 = vpack.c.bf16 %v907_v17, %v907_v17  ;;  %v909_v24 = vmul.f32 0.125, %v252_v56  ;;  %v916_v26 = vpack.c.bf16 %v908_v22, %v908_v22 }
  0xeb   :  { %v917_v31 = vpack.c.bf16 %v909_v24, %v909_v24 }
  0xf4   :  { %v314_v58 = vpop.f32.mrb[4].mxu0 }
  0xf5   :  { %v2261_v59 = vpop.f32.mrb[5].mxu0  ;;  %v910_v37 = vmul.f32 0.125, %v314_v58 }
  0xf6   :  { %v2886_v60 = vpop.f32.mrb[6].mxu0  ;;  %v2888_v61 = vpop.f32.mrb[4].mxu1 }
  0xf7   :  { %v2262_v62 = vpop.f32.mrb[7].mxu0  ;;  %v2273_v63 = vpop.f32.mrb[5].mxu1  ;;  %v911_v41 = vmul.f32 0.125, %v2886_v60  ;;  %v918_v43 = vpack.c.bf16 %v910_v37, %v910_v37  ;;  %v912_v47 = vmul.f32 0.125, %v2888_v61 }
  0xf8   :  { %v2890_v0 = vpop.f32.mrb[6].mxu1 }
  0xf9   :  { %v2274_v2 = vpop.f32.mrb[7].mxu1  ;;  %v919_v45 = vpack.c.bf16 %v911_v41, %v911_v41  ;;  %v913_v48 = vmul.f32 0.125, %v2890_v0  ;;  %v920_v49 = vpack.c.bf16 %v912_v47, %v912_v47 }
  0xfb   :  { %v921_v50 = vpack.c.bf16 %v913_v48, %v913_v48 }
 0x104   :  { %v444_v3 = vpop.f32.mrb[8].mxu0 }
 0x105   :  { %v922_v4 = vpack.c.bf16 %v444_v3, %v444_v3  ;;  %v2285_v5 = vpop.f32.mrb[9].mxu0 }
 0x106   :  { %v447_v6 = vpop.f32.mrb[10].mxu0  ;;  %v509_v7 = vpop.f32.mrb[8].mxu1 }
 0x107   :  { %v948_v8 = vsel %vm943_vm2, %v922_v4, 0  ;;  %v923_v9 = vpack.c.bf16 %v447_v6, %v447_v6  ;;  %v2286_v10 = vpop.f32.mrb[11].mxu0  ;;  %v2297_v11 = vpop.f32.mrb[9].mxu1  ;;  %v924_v15 = vpack.c.bf16 %v509_v7, %v509_v7 }
 0x108   :  { %2372 = vmatpush3.bf16.xpose.msra.mxu0 %v948_v8  ;;  %v512_v12 = vpop.f32.mrb[10].mxu1 }
 0x109   :  { %v994_v14 = vsel %vm943_vm2, %v923_v9, 0  ;;  %v2298_v16 = vpop.f32.mrb[11].mxu1  ;;  %2383 = vmatprep.subr.bf16.mxu0 %v2605_v1  ;;  %v1040_v19 = vsel %vm943_vm2, %v924_v15, 0  ;;  %v925_v20 = vpack.c.bf16 %v512_v12, %v512_v12 }
 0x10a   :  { %2378 = vmatpush3.bf16.xpose.msra.mxu1 %v994_v14 }
 0x10b   :  { %2389 = vmatprep.subr.bf16.mxu1 %v2605_v1  ;;  %v1086_v23 = vsel %vm943_vm2, %v925_v20, 0  ;;  %v938_v20 = vlaneseq }
 0x10d   :  { %v941_v22 = vand.u32 127, %v938_v20 }
 0x10f   :  { %2374 = vmatmul.mubr.msk.bf16.vlgmr.msra.gmra.mrb[24].mxu0 %vm943_vm2, %v914_v18 }
 0x110   :  { %2384 = vmatpush3.bf16.xpose.msra.mxu0 %v1040_v19  ;;  %2385 = vmatprep.mubr.msk.bf16.mxu0 %vm2606_vm0, %v2605_v1 }
 0x111   :  { %2380 = vmatmul.mubr.msk.bf16.vlgmr.msra.gmra.mrb[24].mxu1 %vm943_vm2, %v915_v21  ;;  %2395 = vmatprep.subr.bf16.mxu0 %v2605_v1  ;;  %v939_v21 = vshrl.u32 %v938_v20, 7 }
 0x112   :  { %2390 = vmatpush3.bf16.xpose.msra.mxu1 %v1086_v23  ;;  %2391 = vmatprep.mubr.msk.bf16.mxu1 %vm2606_vm0, %v2605_v1 }
 0x113   :  { %2401 = vmatprep.subr.bf16.mxu1 %v2605_v1  ;;  %vm2957_vm4 = vcmp.le.s32.totalorder %v941_v22, %v939_v21 }
 0x114   :  { %v574_v25 = vpop.f32.mrb[12].mxu0 }
 0x115   :  { %v926_v27 = vpack.c.bf16 %v574_v25, %v574_v25  ;;  %v2309_v28 = vpop.f32.mrb[13].mxu0 }
 0x116   :  { %v577_v29 = vpop.f32.mrb[14].mxu0  ;;  %v639_v30 = vpop.f32.mrb[12].mxu1 }
 0x117   :  { %v1132_v32 = vsel %vm943_vm2, %v926_v27, 0  ;;  %v927_v33 = vpack.c.bf16 %v577_v29, %v577_v29  ;;  %v2310_v34 = vpop.f32.mrb[15].mxu0  ;;  %2386 = vmatmul.mubr.msk.bf16.vlgmr.msra.gmra.mrb[28].mxu0 %vm943_vm2, %v916_v26  ;;  %v2321_v35 = vpop.f32.mrb[13].mxu1  ;;  %v928_v39 = vpack.c.bf16 %v639_v30, %v639_v30 }
 0x118   :  { %2396 = vmatpush3.bf16.xpose.msra.mxu0 %v1132_v32  ;;  %v642_v36 = vpop.f32.mrb[14].mxu1  ;;  %2397 = vmatprep.mubr.msk.bf16.mxu0 %vm2606_vm0, %v2605_v1 }
 0x119   :  { %v1178_v38 = vsel %vm943_vm2, %v927_v33, 0  ;;  %2392 = vmatmul.mubr.msk.bf16.vlgmr.msra.gmra.mrb[28].mxu1 %vm943_vm2, %v917_v31  ;;  %v2322_v40 = vpop.f32.mrb[15].mxu1  ;;  %2407 = vmatprep.subr.bf16.mxu0 %v2605_v1  ;;  %v929_v42 = vpack.c.bf16 %v642_v36, %v642_v36  ;;  %v1224_v44 = vsel %vm943_vm2, %v928_v39, 0 }
 0x11a   :  { %2402 = vmatpush3.bf16.xpose.msra.mxu1 %v1178_v38  ;;  %2403 = vmatprep.mubr.msk.bf16.mxu1 %vm2606_vm0, %v2605_v1 }
 0x11b   :  { %2413 = vmatprep.subr.bf16.mxu1 %v2605_v1  ;;  %v1270_v46 = vsel %vm943_vm2, %v929_v42, 0 }
 0x11f   :  { %2398 = vmatmul.mubr.msk.bf16.vlgmr.msra.gmra.mrb[32].mxu0 %vm943_vm2, %v918_v43 }
 0x120   :  { %2408 = vmatpush3.bf16.xpose.msra.mxu0 %v1224_v44  ;;  %2409 = vmatprep.mubr.msk.bf16.mxu0 %vm2606_vm0, %v2605_v1 }
 0x121   :  { %2404 = vmatmul.mubr.msk.bf16.vlgmr.msra.gmra.mrb[32].mxu1 %vm943_vm2, %v919_v45  ;;  %2419 = vmatprep.subr.bf16.mxu0 %v2605_v1 }
 0x122   :  { %2414 = vmatpush3.bf16.xpose.msra.mxu1 %v1270_v46  ;;  %2415 = vmatprep.mubr.msk.bf16.mxu1 %vm2606_vm0, %v2605_v1 }
 0x123   :  { %2425 = vmatprep.subr.bf16.mxu1 %v2605_v1 }
 0x124   :  { %v704_v51 = vpop.f32.mrb[16].mxu0 }
 0x125   :  { %v930_v52 = vpack.c.bf16 %v704_v51, %v704_v51  ;;  %v2333_v53 = vpop.f32.mrb[17].mxu0 }
 0x126   :  { %v707_v54 = vpop.f32.mrb[18].mxu0  ;;  %v769_v58 = vpop.f32.mrb[16].mxu1 }
 0x127   :  { %2410 = vmatmul.mubr.msk.bf16.vlgmr.msra.gmra.mrb[36].mxu0 %vm943_vm2, %v920_v49  ;;  %v1424_v55 = vsel %vm1422_vm3, %v930_v52, 0  ;;  %v931_v56 = vpack.c.bf16 %v707_v54, %v707_v54  ;;  %v2334_v57 = vpop.f32.mrb[19].mxu0  ;;  %v932_v60 = vpack.c.bf16 %v769_v58, %v769_v58  ;;  %v2345_v61 = vpop.f32.mrb[17].mxu1 }
 0x128   :  { %2421 = vmatprep.mubr.msk.bf16.mxu0 %vm2606_vm0, %v2605_v1  ;;  %2420 = vmatpush3.bf16.msra.mxu0 %v1424_v55  ;;  %v772_v62 = vpop.f32.mrb[18].mxu1 }
 0x129   :  { %2416 = vmatmul.mubr.msk.bf16.vlgmr.msra.gmra.mrb[36].mxu1 %vm943_vm2, %v921_v50  ;;  %v1470_v59 = vsel %vm1422_vm3, %v931_v56, 0  ;;  %2431 = vmatprep.subr.bf16.mxu0 %v2605_v1  ;;  %v2939_v63 = vsel %vm1422_vm3, %v932_v60, 0  ;;  %v933_v0 = vpack.c.bf16 %v772_v62, %v772_v62  ;;  %v2346_v2 = vpop.f32.mrb[19].mxu1 }
 0x12a   :  { %2427 = vmatprep.mubr.msk.bf16.mxu1 %vm2606_vm0, %v2605_v1  ;;  %2426 = vmatpush3.bf16.msra.mxu1 %v1470_v59 }
 0x12b   :  { %2437 = vmatprep.subr.bf16.mxu1 %v2605_v1  ;;  %v2943_v3 = vsel %vm1422_vm3, %v933_v0, 0 }
 0x134   :  { %v834_v4 = vpop.f32.mrb[20].mxu0 }
 0x135   :  { %v934_v5 = vpack.c.bf16 %v834_v4, %v834_v4  ;;  %v2357_v6 = vpop.f32.mrb[21].mxu0 }
 0x136   :  { %v837_v7 = vpop.f32.mrb[22].mxu0  ;;  %v899_v8 = vpop.f32.mrb[20].mxu1 }
 0x137   :  { %v2946_v9 = vsel %vm1422_vm3, %v934_v5, 0  ;;  %v935_v10 = vpack.c.bf16 %v837_v7, %v837_v7  ;;  %v2358_v11 = vpop.f32.mrb[23].mxu0  ;;  %v936_v12 = vpack.c.bf16 %v899_v8, %v899_v8  ;;  %v2369_v13 = vpop.f32.mrb[21].mxu1 }
 0x138   :  { %v902_v14 = vpop.f32.mrb[22].mxu1 }
 0x139   :  { %v2949_v15 = vsel %vm1422_vm3, %v935_v10, 0  ;;  %v2952_v16 = vsel %vm1422_vm3, %v936_v12, 0  ;;  %v937_v17 = vpack.c.bf16 %v902_v14, %v902_v14  ;;  %v2370_v18 = vpop.f32.mrb[23].mxu1 }
 0x13b   :  { %v2955_v19 = vsel %vm1422_vm3, %v937_v17, 0 }
 0x1e2   :  { %v984_v24 = vpop.f32.mrb[24].mxu0 }
 0x1e3   :  { %v1314_v25 = vsel %vm2957_vm4, %v984_v24, -1e+30  ;;  %v2375_v26 = vpop.f32.mrb[25].mxu0 }
 0x1e4   :  { %v987_v27 = vpop.f32.mrb[26].mxu0  ;;  %v1030_v28 = vpop.f32.mrb[24].mxu1  ;;  %v1323_v29 = vsel %vm1322_vm5, %v1314_v25, -inf }
 0x1e5   :  { %v1315_v30 = vsel %vm2957_vm4, %v1030_v28, -1e+30  ;;  %v2381_v31 = vpop.f32.mrb[25].mxu1  ;;  %1324 = vmax.xlane.f32.xlu0 %v1323_v29  ;;  %v2376_v32 = vpop.f32.mrb[27].mxu0 }
 0x1e6   :  { %v1033_v33 = vpop.f32.mrb[26].mxu1  ;;  %v1326_v35 = vsel %vm1322_vm5, %v1315_v30, -inf }
 0x1e7   :  { %v2382_v34 = vpop.f32.mrb[27].mxu1 }
 0x1e9   :  { %1327 = vmax.xlane.f32.xlu0 %v1326_v35 }
 0x1ea   :  { %v1076_v36 = vpop.f32.mrb[28].mxu0 }
 0x1eb   :  { %v1316_v37 = vsel %vm2957_vm4, %v1076_v36, -1e+30  ;;  %v2387_v38 = vpop.f32.mrb[29].mxu0 }
 0x1ec   :  { %v1079_v39 = vpop.f32.mrb[30].mxu0  ;;  %v1122_v40 = vpop.f32.mrb[28].mxu1  ;;  %v1329_v41 = vsel %vm1322_vm5, %v1316_v37, -inf }
 0x1ed   :  { %v1317_v42 = vsel %vm2957_vm4, %v1122_v40, -1e+30  ;;  %v2393_v43 = vpop.f32.mrb[29].mxu1  ;;  %1330 = vmax.xlane.f32.xlu1 %v1329_v41  ;;  %v2388_v44 = vpop.f32.mrb[31].mxu0 }
 0x1ee   :  { %v1125_v45 = vpop.f32.mrb[30].mxu1  ;;  %v1332_v47 = vsel %vm1322_vm5, %v1317_v42, -inf }
 0x1ef   :  { %v2394_v46 = vpop.f32.mrb[31].mxu1 }
 0x1f1   :  { %1333 = vmax.xlane.f32.xlu1 %v1332_v47 }
 0x1f2   :  { %v1168_v48 = vpop.f32.mrb[32].mxu0 }
 0x1f3   :  { %v1318_v49 = vsel %vm2957_vm4, %v1168_v48, -1e+30  ;;  %v2399_v50 = vpop.f32.mrb[33].mxu0 }
 0x1f4   :  { %v1171_v51 = vpop.f32.mrb[34].mxu0  ;;  %v1214_v52 = vpop.f32.mrb[32].mxu1  ;;  %v1335_v53 = vsel %vm1322_vm5, %v1318_v49, -inf }
 0x1f5   :  { %v1319_v54 = vsel %vm2957_vm4, %v1214_v52, -1e+30  ;;  %v2405_v55 = vpop.f32.mrb[33].mxu1  ;;  %1336 = vmax.xlane.f32.xlu0 %v1335_v53  ;;  %v2400_v56 = vpop.f32.mrb[35].mxu0 }
 0x1f6   :  { %v1217_v57 = vpop.f32.mrb[34].mxu1  ;;  %v1338_v58 = vsel %vm1322_vm5, %v1319_v54, -inf }
 0x1f7   :  { %v2406_v59 = vpop.f32.mrb[35].mxu1  ;;  %1339 = vmax.xlane.f32.xlu1 %v1338_v58 }
 0x1fa   :  { %v1260_v60 = vpop.f32.mrb[36].mxu0 }
 0x1fb   :  { %v1320_v61 = vsel %vm2957_vm4, %v1260_v60, -1e+30  ;;  %v2411_v62 = vpop.f32.mrb[37].mxu0 }
 0x1fc   :  { %v1263_v0 = vpop.f32.mrb[38].mxu0  ;;  %v1306_v2 = vpop.f32.mrb[36].mxu1  ;;  %v1341_v4 = vsel %vm1322_vm5, %v1320_v61, -inf }
 0x1fd   :  { %v1321_v5 = vsel %vm2957_vm4, %v1306_v2, -1e+30  ;;  %v2417_v6 = vpop.f32.mrb[37].mxu1  ;;  %1342 = vmax.xlane.f32.xlu0 %v1341_v4  ;;  %v2412_v7 = vpop.f32.mrb[39].mxu0 }
 0x1fe   :  { %v1309_v8 = vpop.f32.mrb[38].mxu1  ;;  %v1344_v10 = vsel %vm1322_vm5, %v1321_v5, -inf }
 0x1ff   :  { %v2418_v11 = vpop.f32.mrb[39].mxu1  ;;  %1345 = vmax.xlane.f32.xlu1 %v1344_v10 }
 0x272   :  { %v1325_v12 = vpop.xlane.xlu0 %1324 }
 0x273   :  { %v1347_v13 = vsub.f32 %v1314_v25, %v1325_v12 }
 0x275   :  { %v1355_v14 = vmul.f32 1.442695, %v1347_v13 }
 0x276   :  { %v1328_v17 = vpop.xlane.xlu0 %1327 }
 0x277   :  { %2549 = vpow2.f32 %v1355_v14  ;;  %v1348_v18 = vsub.f32 %v1315_v30, %v1328_v17 }
 0x279   :  { %v1357_v20 = vmul.f32 1.442695, %v1348_v18 }
 0x27a   :  { %v1331_v21 = vpop.xlane.xlu1 %1330 }
 0x27b   :  { %2551 = vpow2.f32 %v1357_v20  ;;  %v1349_v22 = vsub.f32 %v1316_v37, %v1331_v21 }
 0x27d   :  { %v1359_v23 = vmul.f32 1.442695, %v1349_v22 }
 0x27e   :  { %v1334_v24 = vpop.xlane.xlu1 %1333 }
 0x27f   :  { %2553 = vpow2.f32 %v1359_v23  ;;  %v1350_v26 = vsub.f32 %v1317_v42, %v1334_v24 }
 0x281   :  { %v2550_v27 = vpop.eup %2549  ;;  %v1361_v28 = vmul.f32 1.442695, %v1350_v26  ;;  %v2546_v26 = vld [vmem:[%s3082_s2 + $0x8] sm:$0xff]  }
 0x282   :  { %v1337_v29 = vpop.xlane.xlu0 %1336  ;;  %v1371_v31 = vsel %vm1322_vm5, %v2550_v27, 0.0 }
 0x283   :  { %2555 = vpow2.f32 %v1361_v28  ;;  %v1351_v32 = vsub.f32 %v1318_v49, %v1337_v29  ;;  %1372 = vadd.xlane.f32.xlu0 %v1371_v31 }
 0x284   :  { %v1340_v25 = vpop.xlane.xlu1 %1339 }
 0x285   :  { %v2552_v33 = vpop.eup %2551  ;;  %v1363_v34 = vmul.f32 1.442695, %v1351_v32  ;;  %v1352_v30 = vsub.f32 %v1319_v54, %v1340_v25  ;;  %v2547_v25 = vld [vmem:[%s3082_s2 + $0x10] sm:$0xff]  }
 0x286   :  { %v1374_v35 = vsel %vm1322_vm5, %v2552_v33, 0.0 }
 0x287   :  { %2557 = vpow2.f32 %v1363_v34  ;;  %v1365_v36 = vmul.f32 1.442695, %v1352_v30  ;;  %1375 = vadd.xlane.f32.xlu1 %v1374_v35 }
 0x289   :  { %v2554_v37 = vpop.eup %2553  ;;  %2559 = vpow2.f32 %v1365_v36 }
 0x28a   :  { %v1343_v38 = vpop.xlane.xlu0 %1342  ;;  %v1377_v39 = vsel %vm1322_vm5, %v2554_v37, 0.0 }
 0x28b   :  { %v1353_v40 = vsub.f32 %v1320_v61, %v1343_v38  ;;  %1378 = vadd.xlane.f32.xlu0 %v1377_v39 }
 0x28c   :  { %v1346_v41 = vpop.xlane.xlu1 %1345 }
 0x28d   :  { %v2556_v42 = vpop.eup %2555  ;;  %v1367_v43 = vmul.f32 1.442695, %v1353_v40  ;;  %v1354_v44 = vsub.f32 %v1321_v5, %v1346_v41  ;;  %v2548_v41 = vld [vmem:[%s3082_s2 + $0x18] sm:$0xff]  }
 0x28e   :  { %v1380_v45 = vsel %vm1322_vm5, %v2556_v42, 0.0 }
 0x28f   :  { %2561 = vpow2.f32 %v1367_v43  ;;  %v1369_v46 = vmul.f32 1.442695, %v1354_v44  ;;  %1381 = vadd.xlane.f32.xlu1 %v1380_v45 }
 0x291   :  { %v2558_v47 = vpop.eup %2557  ;;  %2563 = vpow2.f32 %v1369_v46 }
 0x292   :  { %v1383_v48 = vsel %vm1322_vm5, %v2558_v47, 0.0 }
 0x293   :  { %v2560_v49 = vpop.eup %2559  ;;  %1384 = vadd.xlane.f32.xlu0 %v1383_v48 }
 0x294   :  { %v1386_v50 = vsel %vm1322_vm5, %v2560_v49, 0.0 }
 0x295   :  { %1387 = vadd.xlane.f32.xlu1 %v1386_v50 }
 0x299   :  { %v2562_v51 = vpop.eup %2561 }
 0x29a   :  { %v1389_v52 = vsel %vm1322_vm5, %v2562_v51, 0.0 }
 0x29b   :  { %v2992_v53 = vpop.eup %2563  ;;  %1390 = vadd.xlane.f32.xlu0 %v1389_v52 }
 0x29c   :  { %v1392_v54 = vsel %vm1322_vm5, %v2992_v53, 0.0 }
 0x29d   :  { %1393 = vadd.xlane.f32.xlu1 %v1392_v54 }
 0x310   :  { %v1373_v55 = vpop.xlane.xlu0 %1372 }
 0x311   :  { %2565 = vrcp.f32 %v1373_v55 }
 0x314   :  { %v1376_v56 = vpop.xlane.xlu1 %1375 }
 0x315   :  { %2567 = vrcp.f32 %v1376_v56 }
 0x318   :  { %v1379_v57 = vpop.xlane.xlu0 %1378 }
 0x319   :  { %2569 = vrcp.f32 %v1379_v57 }
 0x31b   :  { %v2566_v58 = vpop.eup %2565 }
 0x31c   :  { %v1403_v59 = vmul.f32 %v2566_v58, %v2550_v27  ;;  %v1382_v60 = vpop.xlane.xlu1 %1381 }
 0x31d   :  { %2571 = vrcp.f32 %v1382_v60 }
 0x31e   :  { %v1411_v61 = vpack.c.bf16 %v1403_v59, %v1403_v59 }
 0x31f   :  { %v2568_v62 = vpop.eup %2567 }
 0x320   :  { %v1404_v0 = vmul.f32 %v2568_v62, %v2552_v33  ;;  %2422 = vmatmul.mubr.msk.bf16.vlgmr.msra.gmra.mrb[40].mxu0 %vm1322_vm5, %v1411_v61  ;;  %v1385_v2 = vpop.xlane.xlu0 %1384 }
 0x321   :  { %2432 = vmatpush3.bf16.msra.mxu0 %v2939_v63  ;;  %2573 = vrcp.f32 %v1385_v2  ;;  %2433 = vmatprep.mubr.msk.bf16.mxu0 %vm2606_vm0, %v2605_v1 }
 0x322   :  { %v1388_v4 = vpop.xlane.xlu1 %1387  ;;  %v1412_v5 = vpack.c.bf16 %v1404_v0, %v1404_v0  ;;  %2443 = vmatprep.subr.bf16.mxu0 %v2605_v1 }
 0x323   :  { %v2570_v6 = vpop.eup %2569  ;;  %2575 = vrcp.f32 %v1388_v4 }
 0x324   :  { %v1405_v7 = vmul.f32 %v2570_v6, %v2554_v37  ;;  %2428 = vmatmul.mubr.msk.bf16.vlgmr.msra.gmra.mrb[40].mxu1 %vm1322_vm5, %v1412_v5 }
 0x325   :  { %2438 = vmatpush3.bf16.msra.mxu1 %v2943_v3  ;;  %2439 = vmatprep.mubr.msk.bf16.mxu1 %vm2606_vm0, %v2605_v1 }
 0x326   :  { %v1413_v8 = vpack.c.bf16 %v1405_v7, %v1405_v7  ;;  %2449 = vmatprep.subr.bf16.mxu1 %v2605_v1 }
 0x327   :  { %v2572_v63 = vpop.eup %2571 }
 0x328   :  { %v1406_v10 = vmul.f32 %v2572_v63, %v2556_v42  ;;  %2434 = vmatmul.mubr.msk.bf16.vlgmr.msra.gmra.mrb[44].mxu0 %vm1322_vm5, %v1413_v8  ;;  %v1391_v11 = vpop.xlane.xlu0 %1390 }
 0x329   :  { %2444 = vmatpush3.bf16.msra.mxu0 %v2946_v9  ;;  %2577 = vrcp.f32 %v1391_v11  ;;  %2445 = vmatprep.mubr.msk.bf16.mxu0 %vm2606_vm0, %v2605_v1 }
 0x32a   :  { %v1394_v12 = vpop.xlane.xlu1 %1393  ;;  %v1414_v13 = vpack.c.bf16 %v1406_v10, %v1406_v10  ;;  %2455 = vmatprep.subr.bf16.mxu0 %v2605_v1 }
 0x32b   :  { %v2574_v3 = vpop.eup %2573  ;;  %2579 = vrcp.f32 %v1394_v12 }
 0x32c   :  { %v1407_v14 = vmul.f32 %v2574_v3, %v2558_v47  ;;  %2440 = vmatmul.mubr.msk.bf16.vlgmr.msra.gmra.mrb[44].mxu1 %vm1322_vm5, %v1414_v13 }
 0x32d   :  { %v2576_v17 = vpop.eup %2575  ;;  %2450 = vmatpush3.bf16.msra.mxu1 %v2949_v15  ;;  %2451 = vmatprep.mubr.msk.bf16.mxu1 %vm2606_vm0, %v2605_v1 }
 0x32e   :  { %v1408_v9 = vmul.f32 %v2576_v17, %v2560_v49  ;;  %v1415_v18 = vpack.c.bf16 %v1407_v14, %v1407_v14  ;;  %2461 = vmatprep.subr.bf16.mxu1 %v2605_v1 }
 0x330   :  { %2446 = vmatmul.mubr.msk.bf16.vlgmr.msra.gmra.mrb[48].mxu0 %vm1322_vm5, %v1415_v18  ;;  %v1416_v20 = vpack.c.bf16 %v1408_v9, %v1408_v9 }
 0x331   :  { %2456 = vmatpush3.bf16.msra.mxu0 %v2952_v16  ;;  %2457 = vmatprep.mubr.msk.bf16.mxu0 %vm2606_vm0, %v2605_v1 }
 0x332   :  { %2467 = vmatprep.subr.bf16.mxu0 %v2605_v1 }
 0x333   :  { %v2578_v21 = vpop.eup %2577 }
 0x334   :  { %v1409_v22 = vmul.f32 %v2578_v21, %v2562_v51  ;;  %2452 = vmatmul.mubr.msk.bf16.vlgmr.msra.gmra.mrb[48].mxu1 %vm1322_vm5, %v1416_v20 }
 0x335   :  { %v2580_v15 = vpop.eup %2579  ;;  %2462 = vmatpush3.bf16.msra.mxu1 %v2955_v19  ;;  %2463 = vmatprep.mubr.msk.bf16.mxu1 %vm2606_vm0, %v2605_v1  ;;  %v2545_v19 = vld [vmem:[%s3082_s2] sm:$0xff]  }
 0x336   :  { %v1417_v23 = vpack.c.bf16 %v1409_v22, %v1409_v22  ;;  %v1410_v24 = vmul.f32 %v2580_v15, %v2992_v53  ;;  %2473 = vmatprep.subr.bf16.mxu1 %v2605_v1 }
 0x338   :  { %2458 = vmatmul.mubr.msk.bf16.vlgmr.msra.gmra.mrb[52].mxu0 %vm1322_vm5, %v1417_v23  ;;  %v1418_v16 = vpack.c.bf16 %v1410_v24, %v1410_v24 }
 0x339   :  { %2469 = vmatprep.mubr.msk.bf16.mxu0 %vm2606_vm0, %v2605_v1  ;;  %2468 = vmatpush3.bf16.msra.mxu0 %v2545_v19  ;;  %v2126_v19 = vld [vmem:[%s3083_s3] ss:$0 sm:$0xff] }
 0x33a   :  { %2479 = vmatprep.subr.bf16.mxu0 %v2605_v1 }
 0x33c   :  { %2464 = vmatmul.mubr.msk.bf16.vlgmr.msra.gmra.mrb[52].mxu1 %vm1322_vm5, %v1418_v16 }
 0x33d   :  { %2475 = vmatprep.mubr.msk.bf16.mxu1 %vm2606_vm0, %v2605_v1  ;;  %2474 = vmatpush3.bf16.msra.mxu1 %v2546_v26 }
 0x33e   :  { %2485 = vmatprep.subr.bf16.mxu1 %v2605_v1 }
 0x3f3   :  { %v1460_v27 = vpop.f32.mrb[40].mxu0 }
 0x3f4   :  { %v2423_v28 = vpop.f32.mrb[41].mxu0 }
 0x3f5   :  { %v1463_v29 = vpop.f32.mrb[42].mxu0 }
 0x3f6   :  { %v2424_v31 = vpop.f32.mrb[43].mxu0 }
 0x3f7   :  { %v1506_v32 = vpop.f32.mrb[40].mxu1 }
 0x3f8   :  { %v1788_v33 = vpack.c.bf16 %v1506_v32, %v1460_v27  ;;  %v2429_v34 = vpop.f32.mrb[41].mxu1 }
 0x3f9   :  { %v1509_v30 = vpop.f32.mrb[42].mxu1 }
 0x3fa   :  { %v2430_v35 = vpop.f32.mrb[43].mxu1  ;;  %2470 = vmatmul.mubr.msk.bf16.vlgmr.msra.gmra.mrb[56].mxu0 %vm943_vm2, %v1788_v33 }
 0x3fb   :  { %v1552_v36 = vpop.f32.mrb[44].mxu0  ;;  %2480 = vmatpush3.bf16.msra.mxu0 %v2547_v25  ;;  %2481 = vmatprep.mubr.msk.bf16.mxu0 %vm2606_vm0, %v2605_v1 }
 0x3fc   :  { %v2435_v37 = vpop.f32.mrb[45].mxu0 }
 0x3fd   :  { %v1555_v38 = vpop.f32.mrb[46].mxu0 }
 0x3fe   :  { %v2436_v39 = vpop.f32.mrb[47].mxu0 }
 0x3ff   :  { %v1598_v40 = vpop.f32.mrb[44].mxu1 }
 0x400   :  { %v1789_v42 = vpack.c.bf16 %v1598_v40, %v1552_v36  ;;  %v2441_v43 = vpop.f32.mrb[45].mxu1 }
 0x401   :  { %v1601_v44 = vpop.f32.mrb[46].mxu1 }
 0x402   :  { %v2442_v45 = vpop.f32.mrb[47].mxu1  ;;  %2476 = vmatmul.mubr.msk.bf16.vlgmr.msra.gmra.mrb[56].mxu1 %vm943_vm2, %v1789_v42 }
 0x403   :  { %v1644_v46 = vpop.f32.mrb[48].mxu0  ;;  %2486 = vmatpush3.bf16.msra.mxu1 %v2548_v41  ;;  %2487 = vmatprep.mubr.msk.bf16.mxu1 %vm2606_vm0, %v2605_v1 }
 0x404   :  { %v2447_v47 = vpop.f32.mrb[49].mxu0 }
 0x405   :  { %v1647_v48 = vpop.f32.mrb[50].mxu0 }
 0x406   :  { %v2448_v49 = vpop.f32.mrb[51].mxu0 }
 0x407   :  { %v1690_v50 = vpop.f32.mrb[48].mxu1 }
 0x408   :  { %v1790_v51 = vpack.c.bf16 %v1690_v50, %v1644_v46  ;;  %v2453_v52 = vpop.f32.mrb[49].mxu1 }
 0x409   :  { %v1693_v53 = vpop.f32.mrb[50].mxu1 }
 0x40a   :  { %v2454_v54 = vpop.f32.mrb[51].mxu1  ;;  %2482 = vmatmul.mubr.msk.bf16.vlgmr.msra.gmra.mrb[60].mxu0 %vm943_vm2, %v1790_v51 }
 0x40b   :  { %v1736_v55 = vpop.f32.mrb[52].mxu0 }
 0x40c   :  { %v2459_v56 = vpop.f32.mrb[53].mxu0 }
 0x40d   :  { %v1739_v57 = vpop.f32.mrb[54].mxu0 }
 0x40e   :  { %v2460_v58 = vpop.f32.mrb[55].mxu0 }
 0x40f   :  { %v1782_v59 = vpop.f32.mrb[52].mxu1 }
 0x410   :  { %v1791_v60 = vpack.c.bf16 %v1782_v59, %v1736_v55  ;;  %v2465_v61 = vpop.f32.mrb[53].mxu1 }
 0x411   :  { %v1785_v62 = vpop.f32.mrb[54].mxu1 }
 0x412   :  { %v2466_v0 = vpop.f32.mrb[55].mxu1  ;;  %2488 = vmatmul.mubr.msk.bf16.vlgmr.msra.gmra.mrb[60].mxu1 %vm943_vm2, %v1791_v60 }
 0x4cd   :  { %v1843_v1 = vpop.f32.mrb[56].mxu0 }
 0x4ce   :  { %v2471_v2 = vpop.f32.mrb[57].mxu0  ;;  %v2000_v7 = vsel %vm146_vm1, %v1843_v1, 0.0 }
 0x4cf   :  { %v1846_v4 = vpop.f32.mrb[58].mxu0 }
 0x4d0   :  { %v2472_v5 = vpop.f32.mrb[59].mxu0  ;;  %v2007_v12 = vsel %vm146_vm1, %v1846_v4, 0.0 }
 0x4d5   :  { %v1893_v6 = vpop.f32.mrb[56].mxu1 }
 0x4d6   :  { %v2001_v8 = vsel %vm146_vm1, %v1893_v6, 0.0  ;;  %v2477_v63 = vpop.f32.mrb[57].mxu1 }
 0x4d7   :  { %v2002_v10 = vadd.f32 %v2001_v8, %v2000_v7  ;;  %v1896_v11 = vpop.f32.mrb[58].mxu1 }
 0x4d8   :  { %v2008_v13 = vsel %vm146_vm1, %v1896_v11, 0.0  ;;  %v2478_v3 = vpop.f32.mrb[59].mxu1 }
 0x4d9   :  { %v2009_v14 = vadd.f32 %v2008_v13, %v2007_v12 }
 0x4dd   :  { %v1943_v17 = vpop.f32.mrb[60].mxu0 }
 0x4de   :  { %v2003_v9 = vsel %vm146_vm1, %v1943_v17, 0.0  ;;  %v2483_v18 = vpop.f32.mrb[61].mxu0 }
 0x4df   :  { %v2004_v20 = vadd.f32 %v2003_v9, %v2002_v10  ;;  %v1946_v21 = vpop.f32.mrb[62].mxu0 }
 0x4e0   :  { %v2010_v22 = vsel %vm146_vm1, %v1946_v21, 0.0  ;;  %v2484_v15 = vpop.f32.mrb[63].mxu0 }
 0x4e1   :  { %v2011_v23 = vadd.f32 %v2010_v22, %v2009_v14 }
 0x4e5   :  { %v1993_v24 = vpop.f32.mrb[60].mxu1 }
 0x4e6   :  { %v2005_v16 = vsel %vm146_vm1, %v1993_v24, 0.0  ;;  %v2489_v26 = vpop.f32.mrb[61].mxu1 }
 0x4e7   :  { %v2006_v27 = vadd.f32 %v2005_v16, %v2004_v20  ;;  %v1996_v28 = vpop.f32.mrb[62].mxu1 }
 0x4e8   :  { %v2012_v29 = vsel %vm146_vm1, %v1996_v28, 0.0  ;;  %v2490_v31 = vpop.f32.mrb[63].mxu1 }
 0x4e9   :  { %v2021_v32 = vadd.f32 %v2126_v19, %v2006_v27  ;;  %v2013_v25 = vadd.f32 %v2012_v29, %v2011_v23 }
 0x4eb   :  { %2023 = vst.msk [vmem:[#allocation2] sm:$0xff] %vm146_vm1, %v2021_v32  ;;  %v2022_v33 = vadd.f32 %v2126_v19, %v2013_v25 }
 0x4ed   :  { %2024 = vst.msk [vmem:[#allocation2 + $0x8] sm:$0xff] %vm146_vm1, %v2022_v33 }
 0x4ee   :  { %2592 = shalt.err (!%p2589_p4)
}
 0x4ef   :  { %s2593_s17 = scalar_lea.hbm %s3084_s4, 256 }
 0x4f0   :  { %p2594_p5 = scmp.ne.s32.totalorder %s3084_s4, %s2593_s17  ;;  %p2597_p6 = scmp.lt.u32.totalorder %s2593_s17, %s3084_s4 }
 0x4f2   :  { %p2599_p7 = pnand %p2597_p6, %p2594_p5 }
 0x4f4   :  { %2602 = shalt.err (!%p2599_p7)
}
 0x4f5   :  { %s2608_s22 = smov 128   ;;  %s2609_s23 = smov 8  }
 0x4f6   :  { %2036 = dma.vmem_to_hbm [thread:$0]  %s2031_s14, 256, %s3084_s4, [#allocation3], %s2608_s22, %s2608_s22, %s2609_s23  }
 0x4f7   :  { %2603 = dma.done.wait [#allocation3], 256  }
 0x4f8   :  { %2604 = vsyncadd [#allocation3], 4294967040 }
 0x4f9   :  { %2040 = vsyncpa [#allocation3], 1 }

</bundles_post_ra>
